<compile_context>
chip_gen: v5e
topology: v5e:2x2
jax: 0.10.0
libtpu: 0.0.40
codegen_flags: <defaults>
</compile_context>

<pallas_src>
import functools

import jax
import jax.numpy as jnp
from jax.experimental import pallas as pl
from jax.experimental.pallas import tpu as pltpu


# ----------------------------------------------------------------------------
# Row-block sizing: biggest multiple-of-8 divisor of n_rows under a VMEM budget
# (budget chosen conservatively so double-buffered in+out fits v7x's 64 MiB).
# ----------------------------------------------------------------------------
def _choose_row_block(n_rows, row_bytes, budget_bytes=2 * 1024 * 1024):
    if n_rows % 8 != 0:
        return n_rows                      # full-extent block is always legal
    best = 8
    cand = 8
    while cand <= n_rows:
        if n_rows % cand == 0 and cand * row_bytes <= budget_bytes:
            best = cand
        cand += 8
    return best


# ----------------------------------------------------------------------------
# Pallas kernel 1: spatial mean reduction  (B, C, H, W) -> (B, C)
# ----------------------------------------------------------------------------
def _pool_kernel(x_ref, o_ref, *, inv_hw):
    # x_ref: (R_BLK, H*W) tile (native dtype); accumulate in f32 in-kernel.
    xs = x_ref[...].astype(jnp.float32)
    o_ref[...] = jnp.sum(xs, axis=1, keepdims=True) * inv_hw


def spatial_mean(x):
    B, C, H, W = x.shape
    n, hw = B * C, H * W
    xf = x.reshape(n, hw)                                   # free reshape
    r_blk = _choose_row_block(n, hw * jnp.dtype(x.dtype).itemsize)
    out = pl.pallas_call(
        functools.partial(_pool_kernel, inv_hw=1.0 / hw),
        out_shape=jax.ShapeDtypeStruct((n, 1), jnp.float32),
        grid=(n // r_blk,),
        in_specs=[pl.BlockSpec((r_blk, hw), lambda i: (i, 0))],
        out_specs=pl.BlockSpec((r_blk, 1), lambda i: (i, 0)),
        compiler_params=pltpu.CompilerParams(
            dimension_semantics=("parallel",)),
    )(xf)
    return out.reshape(B, C)


# ----------------------------------------------------------------------------
# Pallas kernel 2: SE scaling + batch-drop masking (elementwise hot path)
# ----------------------------------------------------------------------------
def _mask_kernel(x_ref, sx_ref, sy_ref, scale_ref, o_ref, *, W, HW, rh, rw):
    # x_ref: (R_BLK, H*W); sx/sy/scale: (R_BLK, 1) per-row params in VMEM.
    idx = jax.lax.broadcasted_iota(jnp.int32, (1, HW), 1)
    r_idx = jax.lax.div(idx, jnp.int32(W))      # spatial row of each lane
    c_idx = idx - r_idx * W                     # spatial col of each lane
    sx = sx_ref[...]                            # (R_BLK, 1) int32
    sy = sy_ref[...]
    drop = ((r_idx >= sx) & (r_idx < sx + rh)
            & (c_idx >= sy) & (c_idx < sy + rw))          # (R_BLK, HW)
    scaled = x_ref[...].astype(jnp.float32) * scale_ref[...]
    o_ref[...] = jnp.where(drop, 0.0, scaled).astype(o_ref.dtype)


def scale_and_mask(x, se_scale, sx_i, sy_i, rh, rw):
    B, C, H, W = x.shape
    n, hw = B * C, H * W
    xf = x.reshape(n, hw)                                   # free reshape
    r_blk = _choose_row_block(n, 2 * hw * jnp.dtype(x.dtype).itemsize)
    kernel = functools.partial(_mask_kernel, W=W, HW=hw, rh=rh, rw=rw)
    row_spec = pl.BlockSpec((r_blk, 1), lambda i: (i, 0))
    out = pl.pallas_call(
        kernel,
        out_shape=jax.ShapeDtypeStruct((n, hw), x.dtype),
        grid=(n // r_blk,),
        in_specs=[pl.BlockSpec((r_blk, hw), lambda i: (i, 0)),
                  row_spec, row_spec, row_spec],
        out_specs=pl.BlockSpec((r_blk, hw), lambda i: (i, 0)),
        compiler_params=pltpu.CompilerParams(
            dimension_semantics=("parallel",)),
    )(xf,
      sx_i.reshape(n, 1).astype(jnp.int32),
      sy_i.reshape(n, 1).astype(jnp.int32),
      se_scale.reshape(n, 1).astype(jnp.float32))
    return out.reshape(B, C, H, W)


# ----------------------------------------------------------------------------
# Tiny per-sample heads (glue, plain JAX): SE layer, 1x1 convs, DyReLU-B.
# They operate on (B, C) vectors (the pooled features), negligible compute.
# ----------------------------------------------------------------------------
def _linear(x, w, b):
    return x @ w.T + b


def _dyrelu(v, p, k=2):
    # DyReLU-B on a (B, C, 1, 1) input (spatial pooling is the identity here).
    B, C = v.shape
    theta = jnp.maximum(_linear(v, p["w1"], p["b1"]), 0.0)
    theta = _linear(theta, p["w2"], p["b2"])               # (B, 2*k*C)
    theta = 2.0 * jax.nn.sigmoid(theta) - 1.0
    lambdas = jnp.array([1.0] * k + [0.5] * k, jnp.float32)
    init_v = jnp.array([1.0] + [0.0] * (2 * k - 1), jnp.float32)
    coefs = theta.reshape(B, C, 2 * k) * lambdas + init_v
    a = coefs[..., :k]
    bb = coefs[..., k:]
    return jnp.max(v[..., None] * a + bb, axis=-1)         # (B, C)


def _compute_head(pooled, params, H, W, h_ratio, w_ratio):
    se = params["se"]
    hid = jnp.maximum(_linear(pooled, se["w1"], se["b1"]), 0.0)
    se_scale = jax.nn.sigmoid(_linear(hid, se["w2"], se["b2"]))     # (B, C)
    # g_x = adaptive_avg_pool2d(se(x)) == pooled * se_scale (per-channel scale)
    g = pooled * se_scale
    sx = jax.nn.sigmoid(_dyrelu(
        _linear(g, params["conv_h"]["w"], params["conv_h"]["b"]), params["dyrelu_h"]))
    sy = jax.nn.sigmoid(_dyrelu(
        _linear(g, params["conv_w"]["w"], params["conv_w"]["b"]), params["dyrelu_w"]))
    sx = jnp.ceil(H * sx)
    sy = jnp.ceil(H * sy)   # NOTE: PyTorch multiplies sy by h (not w); reproduced exactly.
    rh = int(h_ratio * H)
    rw = int(w_ratio * W)
    sx = jnp.where(sx > H - rh, float(H - rh), sx)
    sy = jnp.where(sy > W - rw, float(W - rw), sy)
    return se_scale, sx.astype(jnp.int32), sy.astype(jnp.int32), rh, rw


def featguide_batchdrop(x, params, h_ratio=0.05, w_ratio=0.1, training=True):
    if not training:        # module is identity in eval mode
        return x
    B, C, H, W = x.shape
    pooled = spatial_mean(x)                                         # Pallas reduction
    se_scale, sx_i, sy_i, rh, rw = _compute_head(pooled, params, H, W, h_ratio, w_ratio)
    return scale_and_mask(x, se_scale, sx_i, sy_i, rh, rw)           # Pallas elementwise


# ----------------------------------------------------------------------------
# Deterministic parameter init (shapes follow the module's __init__).
# ----------------------------------------------------------------------------
def init_params(key, C, reduction=4, k=2):
    hid = max(C // reduction, 1)
    ks = jax.random.split(key, 12)

    def w(kk, shape, scale=0.3):
        return scale * jax.random.normal(kk, shape, jnp.float32)

    return {
        "se": {"w1": w(ks[0], (hid, C)), "b1": w(ks[1], (hid,)),
               "w2": w(ks[2], (C, hid)), "b2": w(ks[3], (C,))},
        "conv_h": {"w": w(ks[4], (C, C)), "b": w(ks[5], (C,))},       # 1x1 conv == matmul
        "conv_w": {"w": w(ks[6], (C, C)), "b": w(ks[7], (C,))},
        "dyrelu_h": {"w1": w(ks[8], (hid, C)), "b1": jnp.zeros((hid,), jnp.float32),
                     "w2": w(ks[9], (2 * k * C, hid)),
                     "b2": jnp.zeros((2 * k * C,), jnp.float32)},
        "dyrelu_w": {"w1": w(ks[10], (hid, C)), "b1": jnp.zeros((hid,), jnp.float32),
                     "w2": w(ks[11], (2 * k * C, hid)),
                     "b2": jnp.zeros((2 * k * C,), jnp.float32)},
    }


if __name__ == "__main__":
    key = jax.random.PRNGKey(0)
    kx, kp = jax.random.split(key)
    B, C, H, W = 2, 8, 32, 32
    x = jax.random.normal(kx, (B, C, H, W), jnp.float32)
    params = init_params(kp, C)

    # --- sanity: Pallas reduction vs plain-JAX mean ---
    pooled = spatial_mean(x)
    assert jnp.allclose(pooled, jnp.mean(x, axis=(2, 3)), atol=1e-5)

    # --- sanity: Pallas mask/scale kernel vs plain-JAX reference (same head values) ---
    se_scale, sx_i, sy_i, rh, rw = _compute_head(pooled, params, H, W, 0.05, 0.1)
    kern_out = scale_and_mask(x, se_scale, sx_i, sy_i, rh, rw)
    rows = jnp.arange(H)[None, None, :, None]
    cols = jnp.arange(W)[None, None, None, :]
    j = sx_i[:, :, None, None]
    k = sy_i[:, :, None, None]
    drop = (rows >= j) & (rows < j + rh) & (cols >= k) & (cols < k + rw)
    ref_out = x * se_scale[:, :, None, None] * jnp.where(drop, 0.0, 1.0)
    assert jnp.allclose(kern_out, ref_out, atol=1e-5)

    # --- bf16 path: exercises in-kernel upcast + dtype-correct store ---
    out_bf16 = featguide_batchdrop(x.astype(jnp.bfloat16), params, training=True)
    out_bf16 = jax.block_until_ready(out_bf16)
    assert out_bf16.dtype == jnp.bfloat16 and out_bf16.shape == x.shape

    # --- full forward ---
    out = featguide_batchdrop(x, params, training=True)
    out = jax.block_until_ready(out)
    assert out.shape == x.shape and out.dtype == x.dtype
    print("KERNEL_OK")
</pallas_src>

<mosaic_0001>
module attributes {stable_mosaic.version = 11 : i64} {
  func.func @_pool_kernel(%arg0: i32, %arg1: memref<16x1024xf32, #tpu.memory_space<vmem>>, %arg2: memref<16x1xf32, #tpu.memory_space<vmem>>) attributes {dimension_semantics = [#tpu.dimension_semantics<parallel>], iteration_bounds = array<i64: 1>, scalar_prefetch = 0 : i64, scratch_operands = 0 : i64, tpu.core_type = #tpu.core_type<tc>, window_params = [{transform_indices = @transform_0, window_bounds = array<i64: 16, 1024>}, {transform_indices = @transform_1, window_bounds = array<i64: 16, 1>}]} {
    %c0 = arith.constant 0 : index
    %c0_0 = arith.constant 0 : index
    %0 = vector.load %arg1[%c0, %c0_0] : memref<16x1024xf32, #tpu.memory_space<vmem>>, vector<16x1024xf32>
    %cst = arith.constant dense<0.000000e+00> : vector<16xf32>
    %1 = vector.multi_reduction <add>, %0, %cst [1] : vector<16x1024xf32> to vector<16xf32>
    %2 = vector.shape_cast %1 : vector<16xf32> to vector<16x1xf32>
    %cst_1 = arith.constant 9.765625E-4 : f32
    %3 = vector.broadcast %cst_1 : f32 to vector<16x1xf32>
    %4 = arith.mulf %2, %3 : vector<16x1xf32>
    %c0_2 = arith.constant 0 : index
    %c0_3 = arith.constant 0 : index
    %5 = vector.load %arg2[%c0_2, %c0_3] : memref<16x1xf32, #tpu.memory_space<vmem>>, vector<16x1xf32>
    tpu.vector_store %arg2[%c0_2, %c0_3], %4 {strides = array<i32>} : memref<16x1xf32, #tpu.memory_space<vmem>>, vector<16x1xf32>,
    return
  }
  func.func @transform_0(%arg0: i32) -> (i32, i32) {
    %c0_i32 = arith.constant 0 : i32
    %c0_i32_0 = arith.constant 0 : i32
    return %arg0, %c0_i32 : i32, i32
  }
  func.func @transform_1(%arg0: i32) -> (i32, i32) {
    %c0_i32 = arith.constant 0 : i32
    %c0_i32_0 = arith.constant 0 : i32
    return %arg0, %c0_i32 : i32, i32
  }
}

</mosaic_0001>

<bundles_post_ra>
// kernel: tpu_custom_call.1
= control target key start
LH: loop header
LB: loop body
LE: loop exit
PB: predicated region body
PF: predicated region fallthrough
CT: control target
= control target key end

     0   :  { %6 = vsyncpa [#allocation3], 0  ;;  %s97_s9 = smov [#allocation2]   ;;  %s98_s11 = smov 1024   ;;  %s119_s0 = inlined_call_operand.hbm [shape: f32[16,1024], index: 0, kind: input, shape index: {}]   ;;  %s120_s1 = inlined_call_operand.vmem [shape: f32[16,1], index: 1, kind: output, shape index: {}]  }
   0x1   :  { %s11_s8 = sshll.u32 %s119_s0, 4  ;;  %s13_s10 = sshll.u32 %s97_s9, 4  ;;  %s12_s8 = int_to_ptr.hbm [resolvable:$true] %s11_s8  ;;  %s14_s10 = int_to_ptr.vmem [resolvable:$true] %s13_s10 }
   0x2   :  { %s99_s12 = smov 64  }
   0x3   :  { %19 = dma.hbm_to_vmem [thread:$0]  %s12_s8, 2048, %s14_s10, [#allocation3], %s98_s11, %s98_s11, %s99_s12  }
   0x4   :  { %95 = dma.done.wait [#allocation3], 2048  }
   0x5   :  { %96 = vsyncadd [#allocation3], 4294965248  ;;  %v24_v0 = vld [vmem:[#allocation2] sm:$0xff]  ;;  %v25_v1 = vld [vmem:[#allocation2 + $0x8] sm:$0xff]  ;;  %vm60_vm0 = vcmask 7168  }
   0x6   :  { %v26_v2 = vld [vmem:[#allocation2 + $0x10] sm:$0xff]  ;;  %v40_v3 = vadd.f32 %v25_v1, %v24_v0  ;;  %v27_v4 = vld [vmem:[#allocation2 + $0x18] sm:$0xff]  ;;  %v32_v5 = vld [vmem:[#allocation2 + $0x40] sm:$0xff] }
   0x7   :  { %v33_v7 = vld [vmem:[#allocation2 + $0x48] sm:$0xff]  ;;  %v34_v8 = vld [vmem:[#allocation2 + $0x50] sm:$0xff]  ;;  %v28_v9 = vld [vmem:[#allocation2 + $0x20] sm:$0xff] }
   0x8   :  { %v41_v6 = vadd.f32 %v40_v3, %v26_v2  ;;  %v49_v10 = vadd.f32 %v33_v7, %v32_v5  ;;  %v35_v12 = vld [vmem:[#allocation2 + $0x58] sm:$0xff]  ;;  %v29_v13 = vld [vmem:[#allocation2 + $0x28] sm:$0xff]  ;;  %v36_v16 = vld [vmem:[#allocation2 + $0x60] sm:$0xff] }
   0x9   :  { %v30_v17 = vld [vmem:[#allocation2 + $0x30] sm:$0xff]  ;;  %v37_v20 = vld [vmem:[#allocation2 + $0x68] sm:$0xff]  ;;  %v31_v21 = vld [vmem:[#allocation2 + $0x38] sm:$0xff] }
   0xa   :  { %v42_v11 = vadd.f32 %v41_v6, %v27_v4  ;;  %v50_v14 = vadd.f32 %v49_v10, %v34_v8  ;;  %v38_v24 = vld [vmem:[#allocation2 + $0x70] sm:$0xff]  ;;  %v39_v28 = vld [vmem:[#allocation2 + $0x78] sm:$0xff] }
   0xc   :  { %v43_v15 = vadd.f32 %v42_v11, %v28_v9  ;;  %v51_v18 = vadd.f32 %v50_v14, %v35_v12 }
   0xe   :  { %v44_v19 = vadd.f32 %v43_v15, %v29_v13  ;;  %v52_v22 = vadd.f32 %v51_v18, %v36_v16 }
  0x10   :  { %v45_v23 = vadd.f32 %v44_v19, %v30_v17  ;;  %v53_v25 = vadd.f32 %v52_v22, %v37_v20 }
  0x12   :  { %v46_v26 = vadd.f32 %v45_v23, %v31_v21  ;;  %v54_v27 = vadd.f32 %v53_v25, %v38_v24 }
  0x14   :  { %47 = vadd.xlane.f32.xlu0 %v46_v26  ;;  %v55_v29 = vadd.f32 %v54_v27, %v39_v28 }
  0x1c   :  { %56 = vadd.xlane.f32.xlu0 %v55_v29 }
  0x87   :  { %v48_v30 = vpop.xlane.xlu0 %47 }
  0x88   :  { %v58_v31 = vmul.f32 0.0009765625, %v48_v30 }
  0x8a   :  { %61 = vst.msk [vmem:[%s120_s1] sm:$0xff] %vm60_vm0, %v58_v31 }
  0x8f   :  { %v57_v32 = vpop.xlane.xlu0 %56 }
  0x90   :  { %v59_v33 = vmul.f32 0.0009765625, %v57_v32 }
  0x92   :  { %62 = vst.msk [vmem:[%s120_s1 + $0x8] sm:$0xff] %vm60_vm0, %v59_v33 }
  0x93   :  { %67 = vsyncpa [#allocation3], 1 }

</bundles_post_ra>
